<compile_context>
chip_gen: v5e
topology: v5e:2x2
jax: 0.10.0
libtpu: 0.0.40
codegen_flags: <defaults>
</compile_context>

<pallas_src>
import functools

import jax
import jax.numpy as jnp
from jax.experimental import pallas as pl
from jax.experimental.pallas import tpu as pltpu


_MAX_TILE_ROWS = 8192  # upper bound on rows per tile (keeps tiles ~4-8 MiB)


def _round_up(v, m):
    return (v + m - 1) // m * m


def _sublane_multiple(dtype):
    """Native sublane packing multiple: 8 for 4-byte, 16 for 2-byte, 32 for 1-byte."""
    itemsize = jnp.dtype(dtype).itemsize
    return max(8, 32 // itemsize)


def _tpu_params():
    """Return (input_vmem_budget_bytes, vmem_limit_bytes, num_parallel_cores)."""
    vmem_cap = None
    try:
        info = pltpu.get_tpu_info()
        vmem_cap = getattr(info, "vmem_capacity_bytes", None)
    except Exception:
        vmem_cap = None
    if vmem_cap is None:
        try:
            kind = jax.devices()[0].device_kind.lower()
        except Exception:
            kind = ""
        if "v7" in kind:
            vmem_cap = 64 * 1024 * 1024
        elif "v4" in kind or "v5" in kind or "v6" in kind:
            vmem_cap = 128 * 1024 * 1024
        else:
            vmem_cap = 64 * 1024 * 1024  # conservative default
    if vmem_cap <= 64 * 1024 * 1024:
        # v7x-class: 64 MiB VMEM per TensorCore, 2 TCs per chip -> keep the
        # double-buffered input under ~28 MiB and split the parallel row axis.
        return 28 * 1024 * 1024, 48 * 1024 * 1024, 2
    # v5e / v6e: 128 MiB physical VMEM, single TensorCore.
    return 48 * 1024 * 1024, 80 * 1024 * 1024, 1


def _choose_tiles(rows, hw, dtype, input_budget, num_cores):
    """Pick (tile_rows, tile_hw) so 2 * tile bytes stays under the VMEM budget."""
    itemsize = jnp.dtype(dtype).itemsize
    sub = _sublane_multiple(dtype)
    hw_pad = _round_up(hw, 128)   # lane padding counts against VMEM
    rows_pad = _round_up(rows, sub)

    # Preferred: keep the full HW extent in one tile and maximise rows.
    max_rows = (input_budget // (2 * hw_pad * itemsize)) // sub * sub
    if max_rows >= sub:
        tile_r = int(min(_MAX_TILE_ROWS, rows_pad, max_rows))
        tile_r = _round_up(tile_r, sub)
        # Megacore: make sure the "parallel" row axis has >= num_cores tiles so
        # both TensorCores on v7x get work (no-op on single-TC chips).
        if num_cores > 1 and rows_pad > sub:
            per_core = _round_up(pl.cdiv(rows_pad, num_cores), sub)
            tile_r = int(min(tile_r, per_core))
        return tile_r, hw

    # Very large spatial maps: split the HW (reduction) axis instead.
    tile_r = sub
    tile_hw = (input_budget // (2 * tile_r * itemsize)) // 128 * 128
    tile_hw = int(max(128, min(tile_hw, hw_pad)))
    return tile_r, tile_hw


def _concat_pool_single_kernel(x_ref, mx_ref, av_ref, *, inv_hw):
    """Fast path: full HW extent in one tile -> direct per-row max/mean."""
    x = x_ref[...]                                     # native dtype in VMEM
    mx_ref[...] = jnp.max(x, axis=-1, keepdims=True).astype(mx_ref.dtype)
    s = jnp.sum(x, axis=-1, keepdims=True, dtype=jnp.float32)
    av_ref[...] = (s * inv_hw).astype(av_ref.dtype)


def _concat_pool_kernel(x_ref, mx_ref, av_ref, acc_mx, acc_sum, *,
                        hw, tile_hw, need_mask):
    """General path: HW reduction split across grid axis 1 with f32 accumulators."""
    k = pl.program_id(1)
    last = pl.num_programs(1) - 1

    @pl.when(k == 0)
    def _init():
        acc_mx[...] = jnp.full_like(acc_mx, -jnp.inf)
        acc_sum[...] = jnp.zeros_like(acc_sum)

    def _accumulate(x_max, x_sum):
        part_mx = jnp.max(x_max, axis=-1, keepdims=True).astype(jnp.float32)
        part_sum = jnp.sum(x_sum, axis=-1, keepdims=True, dtype=jnp.float32)
        acc_mx[...] = jnp.maximum(acc_mx[...], part_mx)
        acc_sum[...] = acc_sum[...] + part_sum

    if need_mask:
        # Mask is only semantically needed on the final HW tile: keep all earlier
        # steps on the cheap unmasked path (no iota / where temporaries).
        @pl.when(k < last)
        def _full():
            x = x_ref[...]
            _accumulate(x, x)

        @pl.when(k == last)
        def _masked():
            x = x_ref[...]
            col = (jax.lax.broadcasted_iota(jnp.int32, (1, x.shape[-1]), 1)
                   + k * tile_hw)
            valid = col < hw                           # (1, tile_hw), broadcast below
            x_max = jnp.where(valid, x, jnp.array(-jnp.inf, dtype=x.dtype))
            x_sum = jnp.where(valid, x, jnp.array(0, dtype=x.dtype))
            _accumulate(x_max, x_sum)
    else:
        x = x_ref[...]
        _accumulate(x, x)

    @pl.when(k == last)
    def _finalize():
        mx_ref[...] = acc_mx[...].astype(mx_ref.dtype)
        av_ref[...] = (acc_sum[...] * (1.0 / hw)).astype(av_ref.dtype)


def adaptive_concat_pool2d(x, *, _force_tiles=None):
    """x: (N, C, H, W) -> (N, 2*C, 1, 1), matching torch.cat([mp(x), ap(x)], 1)."""
    n, c, h, w = x.shape
    hw = h * w
    rows = n * c
    itemsize = jnp.dtype(x.dtype).itemsize

    x2 = x.reshape(rows, hw)                           # rows on sublanes, HW on lanes

    input_budget, vmem_limit, num_cores = _tpu_params()
    if _force_tiles is not None:                       # test hook for the split path
        tile_r, tile_hw = _force_tiles
    else:
        tile_r, tile_hw = _choose_tiles(rows, hw, x.dtype, input_budget, num_cores)
    num_r = pl.cdiv(rows, tile_r)
    num_k = pl.cdiv(hw, tile_hw)
    need_mask = (hw % tile_hw) != 0

    cost = pl.CostEstimate(
        flops=2 * rows * hw,                           # one max + one add per element
        transcendentals=0,
        bytes_accessed=rows * hw * itemsize + 2 * rows * itemsize,
    )
    out_shape = (jax.ShapeDtypeStruct((rows, 1), x.dtype),
                 jax.ShapeDtypeStruct((rows, 1), x.dtype))

    if num_k == 1 and not need_mask:
        # Common case: whole HW extent in one tile -> no accumulator bookkeeping.
        kernel = functools.partial(_concat_pool_single_kernel, inv_hw=1.0 / hw)
        mx, av = pl.pallas_call(
            kernel,
            out_shape=out_shape,
            grid_spec=pltpu.PrefetchScalarGridSpec(
                num_scalar_prefetch=0,
                grid=(num_r,),
                in_specs=[pl.BlockSpec((tile_r, tile_hw), lambda r: (r, 0))],
                out_specs=[pl.BlockSpec((tile_r, 1), lambda r: (r, 0)),
                           pl.BlockSpec((tile_r, 1), lambda r: (r, 0))],
            ),
            compiler_params=pltpu.CompilerParams(
                dimension_semantics=("parallel",),
                vmem_limit_bytes=vmem_limit,
            ),
            cost_estimate=cost,
        )(x2)
    else:
        kernel = functools.partial(_concat_pool_kernel, hw=hw, tile_hw=tile_hw,
                                   need_mask=need_mask)
        mx, av = pl.pallas_call(
            kernel,
            out_shape=out_shape,
            grid_spec=pltpu.PrefetchScalarGridSpec(
                num_scalar_prefetch=0,
                grid=(num_r, num_k),
                in_specs=[pl.BlockSpec((tile_r, tile_hw), lambda r, k: (r, k))],
                out_specs=[pl.BlockSpec((tile_r, 1), lambda r, k: (r, 0)),
                           pl.BlockSpec((tile_r, 1), lambda r, k: (r, 0))],
                scratch_shapes=[pltpu.VMEM((tile_r, 1), jnp.float32),
                                pltpu.VMEM((tile_r, 1), jnp.float32)],
            ),
            compiler_params=pltpu.CompilerParams(
                dimension_semantics=("parallel", "arbitrary"),
                vmem_limit_bytes=vmem_limit,
            ),
            cost_estimate=cost,
        )(x2)

    mx = mx.reshape(n, c, 1, 1)
    av = av.reshape(n, c, 1, 1)
    return jnp.concatenate([mx, av], axis=1)           # max channels first, then avg


def _ref(x):
    return jnp.concatenate(
        [jnp.max(x, axis=(2, 3), keepdims=True),
         jnp.mean(x, axis=(2, 3), keepdims=True)], axis=1)


if __name__ == "__main__":
    key = jax.random.PRNGKey(0)
    x = jax.random.normal(key, (2, 4, 16, 16), dtype=jnp.float32)

    y = adaptive_concat_pool2d(x)
    jax.block_until_ready(y)
    assert y.shape == (2, 8, 1, 1)
    assert jnp.allclose(y, _ref(x), atol=1e-5, rtol=1e-5)

    # Rows not a multiple of 8 and HW not a multiple of 128 (7x7 CNN head).
    x2 = jax.random.normal(jax.random.PRNGKey(0), (2, 3, 7, 7), dtype=jnp.float32)
    y2 = adaptive_concat_pool2d(x2)
    jax.block_until_ready(y2)
    assert y2.shape == (2, 6, 1, 1)
    assert jnp.allclose(y2, _ref(x2), atol=1e-5, rtol=1e-5)

    # Exercise the split-HW (multi-k) reduction path with overhang masking by
    # forcing small tiles on a small input (hw=288, tile_hw=128 -> 3 k-steps).
    x3 = jax.random.normal(jax.random.PRNGKey(0), (2, 4, 16, 18), dtype=jnp.float32)
    y3 = adaptive_concat_pool2d(x3, _force_tiles=(8, 128))
    jax.block_until_ready(y3)
    assert y3.shape == (2, 8, 1, 1)
    assert jnp.allclose(y3, _ref(x3), atol=1e-5, rtol=1e-5)

    # bf16 input exercises the dtype-aware sublane rounding + f32 mean accumulator.
    x4 = jax.random.normal(jax.random.PRNGKey(0), (2, 4, 16, 16),
                           dtype=jnp.float32).astype(jnp.bfloat16)
    y4 = adaptive_concat_pool2d(x4)
    jax.block_until_ready(y4)
    assert y4.shape == (2, 8, 1, 1)
    assert jnp.allclose(y4.astype(jnp.float32),
                        _ref(x4.astype(jnp.float32)), atol=2e-2, rtol=2e-2)

    print("KERNEL_OK")
</pallas_src>

<mosaic_0001>
module attributes {stable_mosaic.version = 11 : i64} {
  func.func @_concat_pool_single_kernel(%arg0: i32, %arg1: memref<8x256xf32, #tpu.memory_space<vmem>>, %arg2: memref<8x1xf32, #tpu.memory_space<vmem>>, %arg3: memref<8x1xf32, #tpu.memory_space<vmem>>) attributes {dimension_semantics = [#tpu.dimension_semantics<parallel>], iteration_bounds = array<i64: 1>, scalar_prefetch = 0 : i64, scratch_operands = 0 : i64, tpu.core_type = #tpu.core_type<tc>, window_params = [{transform_indices = @transform_0, window_bounds = array<i64: 8, 256>}, {transform_indices = @transform_1, window_bounds = array<i64: 8, 1>}, {transform_indices = @transform_2, window_bounds = array<i64: 8, 1>}]} {
    %c0 = arith.constant 0 : index
    %c0_0 = arith.constant 0 : index
    %0 = vector.load %arg1[%c0, %c0_0] : memref<8x256xf32, #tpu.memory_space<vmem>>, vector<8x256xf32>
    %cst = arith.constant dense<0xFF800000> : vector<8xf32>
    %1 = vector.multi_reduction <maximumf>, %0, %cst [1] : vector<8x256xf32> to vector<8xf32>
    %2 = vector.shape_cast %1 : vector<8xf32> to vector<8x1xf32>
    %c0_1 = arith.constant 0 : index
    %c0_2 = arith.constant 0 : index
    %3 = vector.load %arg2[%c0_1, %c0_2] : memref<8x1xf32, #tpu.memory_space<vmem>>, vector<8x1xf32>
    tpu.vector_store %arg2[%c0_1, %c0_2], %2 {strides = array<i32>} : memref<8x1xf32, #tpu.memory_space<vmem>>, vector<8x1xf32>,
    %cst_3 = arith.constant dense<0.000000e+00> : vector<8xf32>
    %4 = vector.multi_reduction <add>, %0, %cst_3 [1] : vector<8x256xf32> to vector<8xf32>
    %5 = vector.shape_cast %4 : vector<8xf32> to vector<8x1xf32>
    %cst_4 = arith.constant 3.906250e-03 : f32
    %6 = vector.broadcast %cst_4 : f32 to vector<8x1xf32>
    %7 = arith.mulf %5, %6 : vector<8x1xf32>
    %c0_5 = arith.constant 0 : index
    %c0_6 = arith.constant 0 : index
    %8 = vector.load %arg3[%c0_5, %c0_6] : memref<8x1xf32, #tpu.memory_space<vmem>>, vector<8x1xf32>
    tpu.vector_store %arg3[%c0_5, %c0_6], %7 {strides = array<i32>} : memref<8x1xf32, #tpu.memory_space<vmem>>, vector<8x1xf32>,
    return
  }
  func.func @transform_0(%arg0: i32) -> (i32, i32) {
    %c0_i32 = arith.constant 0 : i32
    %c0_i32_0 = arith.constant 0 : i32
    return %arg0, %c0_i32 : i32, i32
  }
  func.func @transform_1(%arg0: i32) -> (i32, i32) {
    %c0_i32 = arith.constant 0 : i32
    %c0_i32_0 = arith.constant 0 : i32
    return %arg0, %c0_i32 : i32, i32
  }
  func.func @transform_2(%arg0: i32) -> (i32, i32) {
    %c0_i32 = arith.constant 0 : i32
    %c0_i32_0 = arith.constant 0 : i32
    return %arg0, %c0_i32 : i32, i32
  }
}

</mosaic_0001>

<bundles_post_ra>
// kernel: tpu_custom_call.1
= control target key start
LH: loop header
LB: loop body
LE: loop exit
PB: predicated region body
PF: predicated region fallthrough
CT: control target
= control target key end

     0   :  { %8 = vsyncpa [#allocation3], 0  ;;  %s72_s12 = smov [#allocation2]   ;;  %s97_s0 = inlined_call_operand.hbm [shape: f32[8,256], index: 0, kind: input, shape index: {}]   ;;  %s98_s1 = inlined_call_operand.vmem [shape: f32[8,1], index: 1, kind: output, shape index: {0}]   ;;  %s99_s2 = inlined_call_operand.vmem [shape: f32[8,1], index: 2, kind: output, shape index: {1}]  }
   0x1   :  { %s14_s11 = sshll.u32 %s97_s0, 4  ;;  %s16_s13 = sshll.u32 %s72_s12, 4  ;;  %s15_s11 = int_to_ptr.hbm [resolvable:$true] %s14_s11  ;;  %s17_s13 = int_to_ptr.vmem [resolvable:$true] %s16_s13 }
   0x2   :  { %19 = dma.hbm_to_vmem [thread:$0]  %s15_s11, 256, %s17_s13, [#allocation3]  }
   0x3   :  { %70 = dma.done.wait [#allocation3], 256  }
   0x4   :  { %71 = vsyncadd [#allocation3], 4294967040  ;;  %v24_v0 = vld [vmem:[#allocation2] sm:$0xff]  ;;  %v25_v1 = vld [vmem:[#allocation2 + $0x8] sm:$0xff]  ;;  %vm29_vm0 = vcmask 7168  }
   0x5   :  { %v31_v2 = vadd.f32 %v25_v1, %v24_v0  ;;  %v26_v3 = vmax.f32 %v24_v0, %v25_v1 }
   0x7   :  { %32 = vadd.xlane.f32.xlu0 %v31_v2 }
   0xf   :  { %27 = vmax.xlane.f32.xlu0 %v26_v3 }
  0x7a   :  { %v33_v4 = vpop.xlane.xlu0 %32 }
  0x7b   :  { %v34_v5 = vmul.f32 0.00390625, %v33_v4 }
  0x7d   :  { %35 = vst.msk [vmem:[%s99_s2] sm:$0xff] %vm29_vm0, %v34_v5 }
  0x82   :  { %v28_v6 = vpop.xlane.xlu0 %27 }
  0x83   :  { %30 = vst.msk [vmem:[%s98_s1] sm:$0xff] %vm29_vm0, %v28_v6 }
  0x84   :  { %44 = vsyncpa [#allocation3], 1 }

</bundles_post_ra>
